<compile_context>
chip_gen: v6e
topology: v6e:2x2x1
jax: 0.10.0
libtpu: 0.0.40
codegen_flags: <defaults>
</compile_context>

<pallas_src>
import functools

import jax
import jax.numpy as jnp
import numpy as np
from jax.experimental import pallas as pl
from jax.experimental.pallas import tpu as pltpu


def _subsample_kernel(x_ref, sw_ref, o_ref, rows_ref, *, h_out, stride, planes, unroll):
    # x_ref   : (B, H, W)            current batch of (n, c) planes
    # sw_ref  : (W, W_out)           one-hot column selector (picks cols j*s)
    # o_ref   : (1, B*H_out, W_out)  output slab for this batch of planes
    # rows_ref: (B*H_out, W)         VMEM scratch holding strided rows of all planes
    def gather(b, carry):
        # Row pick = strided sublane load (no matmul); pack plane b's rows
        # into the flat scratch so the column pick is one big matmul.
        rows_ref[pl.ds(b * h_out, h_out), :] = (
            x_ref[b, pl.ds(0, h_out, stride=stride), :].astype(rows_ref.dtype)
        )
        return carry

    jax.lax.fori_loop(0, planes, gather, 0, unroll=unroll)

    # Single tall-M MXU matmul per grid step: (B*H_out, W) @ (W, W_out).
    y = jnp.dot(rows_ref[...], sw_ref[...], preferred_element_type=jnp.float32)
    o_ref[0] = y.astype(o_ref.dtype)


def _choose_planes_per_block(nc, plane_bytes):
    """Pick B | nc: input block ~6 MiB (double-buffered ~12 MiB, safe on v7x's
    64 MiB VMEM) while keeping >= 2 grid steps when possible (2 TCs on v7x)."""
    target_bytes = 6 * 1024 * 1024
    cap = max(1, target_bytes // max(int(plane_bytes), 1))
    if nc >= 2:
        cap = min(cap, nc // 2)
    cap = max(1, cap)
    best = 1
    for d in range(1, nc + 1):
        if nc % d == 0 and d <= cap:
            best = d
    return best


def subsampling(x, kernel_size, stride=None):
    """Pallas implementation of SubSampling.forward for NCHW input."""
    stride = kernel_size if stride is None else stride
    N, C, H, W = x.shape
    h_out = (H - kernel_size) // stride + 1
    w_out = (W - kernel_size) // stride + 1
    nc = N * C

    if jnp.issubdtype(x.dtype, jnp.floating):
        compute_dtype = x.dtype  # keep bf16 on the bf16 MXU path; selection is exact
    else:
        # TODO(synk): integer inputs are routed through the f32 MXU path; exact
        # only up to 2^24 in magnitude.
        compute_dtype = jnp.float32

    itemsize = jnp.dtype(x.dtype).itemsize
    plane_bytes = H * W * itemsize
    B = _choose_planes_per_block(nc, plane_bytes)
    grid_len = nc // B

    # One-hot column selector in the compute dtype (no learned params here).
    sel_w = (
        jnp.zeros((W, w_out), compute_dtype)
        .at[jnp.arange(w_out) * stride, jnp.arange(w_out)]
        .set(1)
    )

    x_flat = x.reshape(nc, H, W)

    # Size the scoped VMEM limit to the chosen blocks (double-buffered in/out).
    in_block = B * H * W * itemsize
    out_block = B * h_out * w_out * itemsize
    scratch_b = B * h_out * W * jnp.dtype(compute_dtype).itemsize
    sel_b = W * w_out * jnp.dtype(compute_dtype).itemsize
    vmem_need = 2 * in_block + 2 * out_block + scratch_b + 2 * sel_b + (2 << 20)
    vmem_limit = int(min(max(vmem_need, 16 << 20), 40 << 20))

    kernel = functools.partial(
        _subsample_kernel,
        h_out=h_out,
        stride=stride,
        planes=B,
        unroll=(B <= 32),
    )

    out = pl.pallas_call(
        kernel,
        out_shape=jax.ShapeDtypeStruct((grid_len, B * h_out, w_out), x.dtype),
        grid_spec=pltpu.PrefetchScalarGridSpec(
            num_scalar_prefetch=0,
            grid=(grid_len,),
            in_specs=[
                pl.BlockSpec((B, H, W), lambda i: (i, 0, 0)),
                pl.BlockSpec((W, w_out), lambda i: (0, 0)),
            ],
            out_specs=pl.BlockSpec((1, B * h_out, w_out), lambda i: (i, 0, 0)),
            scratch_shapes=[pltpu.VMEM((B * h_out, W), compute_dtype)],
        ),
        compiler_params=pltpu.CompilerParams(
            dimension_semantics=("parallel",),
            vmem_limit_bytes=vmem_limit,
        ),
    )(x_flat, sel_w)

    return out.reshape(N, C, h_out, w_out)


if __name__ == "__main__":
    key = jax.random.PRNGKey(0)
    N, C, H, W = 2, 4, 16, 16
    kernel_size, stride = 4, 4

    x = jax.random.normal(key, (N, C, H, W), dtype=jnp.float32)

    y = subsampling(x, kernel_size, stride)
    y = jax.block_until_ready(y)

    # Pure-JAX reference of the PyTorch unfold/unfold/[..., 0, 0] semantics.
    H_out = (H - kernel_size) // stride + 1
    W_out = (W - kernel_size) // stride + 1
    ref = x[:, :, : H_out * stride : stride, : W_out * stride : stride]

    np.testing.assert_allclose(np.asarray(y), np.asarray(ref), rtol=0, atol=1e-6)
    assert y.shape == (N, C, H_out, W_out)

    print("KERNEL_OK")
</pallas_src>

<mosaic_0001>
module attributes {stable_mosaic.version = 11 : i64} {
  func.func @_subsample_kernel(%arg0: i32, %arg1: memref<4x16x16xf32, #tpu.memory_space<vmem>>, %arg2: memref<16x4xf32, #tpu.memory_space<vmem>>, %arg3: memref<1x16x4xf32, #tpu.memory_space<vmem>>, %arg4: memref<16x16xf32, #tpu.memory_space<vmem>>) attributes {dimension_semantics = [#tpu.dimension_semantics<parallel>], iteration_bounds = array<i64: 2>, scalar_prefetch = 0 : i64, scratch_operands = 1 : i64, tpu.core_type = #tpu.core_type<tc>, window_params = [{transform_indices = @transform_0, window_bounds = array<i64: 4, 16, 16>}, {pipeline_mode = #tpu.pipeline_mode<synchronous>, transform_indices = @transform_1, window_bounds = array<i64: 16, 4>}, {transform_indices = @transform_2, window_bounds = array<i64: 1, 16, 4>}]} {
    %c0_i32 = arith.constant 0 : i32
    %0 = arith.index_cast %c0_i32 : i32 to index
    %c0 = arith.constant 0 : index
    %c0_0 = arith.constant 0 : index
    %1 = tpu.strided_load %arg1[%0, %c0, %c0_0] {strides = array<i32: 1, 4, 1>} : memref<4x16x16xf32, #tpu.memory_space<vmem>>, vector<1x4x16xf32>
    %2 = vector.shape_cast %1 : vector<1x4x16xf32> to vector<4x16xf32>
    %c4_i32 = arith.constant 4 : i32
    %3 = arith.muli %c0_i32, %c4_i32 : i32
    %4 = arith.index_cast %3 : i32 to index
    %c0_1 = arith.constant 0 : index
    %5 = vector.load %arg4[%4, %c0_1] : memref<16x16xf32, #tpu.memory_space<vmem>>, vector<4x16xf32>
    tpu.vector_store %arg4[%4, %c0_1], %2 {strides = array<i32>} : memref<16x16xf32, #tpu.memory_space<vmem>>, vector<4x16xf32>,
    %c1_i32 = arith.constant 1 : i32
    %6 = arith.index_cast %c1_i32 : i32 to index
    %c0_2 = arith.constant 0 : index
    %c0_3 = arith.constant 0 : index
    %7 = tpu.strided_load %arg1[%6, %c0_2, %c0_3] {strides = array<i32: 1, 4, 1>} : memref<4x16x16xf32, #tpu.memory_space<vmem>>, vector<1x4x16xf32>
    %8 = vector.shape_cast %7 : vector<1x4x16xf32> to vector<4x16xf32>
    %c4_i32_4 = arith.constant 4 : i32
    %9 = arith.muli %c1_i32, %c4_i32_4 : i32
    %10 = arith.index_cast %9 : i32 to index
    %c0_5 = arith.constant 0 : index
    %11 = vector.load %arg4[%10, %c0_5] : memref<16x16xf32, #tpu.memory_space<vmem>>, vector<4x16xf32>
    tpu.vector_store %arg4[%10, %c0_5], %8 {strides = array<i32>} : memref<16x16xf32, #tpu.memory_space<vmem>>, vector<4x16xf32>,
    %c2_i32 = arith.constant 2 : i32
    %12 = arith.index_cast %c2_i32 : i32 to index
    %c0_6 = arith.constant 0 : index
    %c0_7 = arith.constant 0 : index
    %13 = tpu.strided_load %arg1[%12, %c0_6, %c0_7] {strides = array<i32: 1, 4, 1>} : memref<4x16x16xf32, #tpu.memory_space<vmem>>, vector<1x4x16xf32>
    %14 = vector.shape_cast %13 : vector<1x4x16xf32> to vector<4x16xf32>
    %c4_i32_8 = arith.constant 4 : i32
    %15 = arith.muli %c2_i32, %c4_i32_8 : i32
    %16 = arith.index_cast %15 : i32 to index
    %c0_9 = arith.constant 0 : index
    %17 = vector.load %arg4[%16, %c0_9] : memref<16x16xf32, #tpu.memory_space<vmem>>, vector<4x16xf32>
    tpu.vector_store %arg4[%16, %c0_9], %14 {strides = array<i32>} : memref<16x16xf32, #tpu.memory_space<vmem>>, vector<4x16xf32>,
    %c3_i32 = arith.constant 3 : i32
    %18 = arith.index_cast %c3_i32 : i32 to index
    %c0_10 = arith.constant 0 : index
    %c0_11 = arith.constant 0 : index
    %19 = tpu.strided_load %arg1[%18, %c0_10, %c0_11] {strides = array<i32: 1, 4, 1>} : memref<4x16x16xf32, #tpu.memory_space<vmem>>, vector<1x4x16xf32>
    %20 = vector.shape_cast %19 : vector<1x4x16xf32> to vector<4x16xf32>
    %c4_i32_12 = arith.constant 4 : i32
    %21 = arith.muli %c3_i32, %c4_i32_12 : i32
    %22 = arith.index_cast %21 : i32 to index
    %c0_13 = arith.constant 0 : index
    %23 = vector.load %arg4[%22, %c0_13] : memref<16x16xf32, #tpu.memory_space<vmem>>, vector<4x16xf32>
    tpu.vector_store %arg4[%22, %c0_13], %20 {strides = array<i32>} : memref<16x16xf32, #tpu.memory_space<vmem>>, vector<4x16xf32>,
    %c4_i32_14 = arith.constant 4 : i32
    %c0_15 = arith.constant 0 : index
    %c0_16 = arith.constant 0 : index
    %24 = vector.load %arg4[%c0_15, %c0_16] : memref<16x16xf32, #tpu.memory_space<vmem>>, vector<16x16xf32>
    %c0_17 = arith.constant 0 : index
    %c0_18 = arith.constant 0 : index
    %25 = vector.load %arg2[%c0_17, %c0_18] : memref<16x4xf32, #tpu.memory_space<vmem>>, vector<16x4xf32>
    %cst = arith.constant dense<0.000000e+00> : vector<16x4xf32>
    %26 = tpu.matmul %24, %25, %cst {dimension_numbers = #tpu.dot_dimension_numbers<[1], [0], [0], [1], [0, 0, 1, 1], [], []>} : vector<16x16xf32>, vector<16x4xf32>, vector<16x4xf32> -> vector<16x4xf32>
    %c0_19 = arith.constant 0 : index
    %c0_20 = arith.constant 0 : index
    %c0_21 = arith.constant 0 : index
    %27 = vector.load %arg3[%c0_19, %c0_20, %c0_21] : memref<1x16x4xf32, #tpu.memory_space<vmem>>, vector<1x16x4xf32>
    %28 = vector.shape_cast %27 : vector<1x16x4xf32> to vector<16x4xf32>
    %29 = vector.shape_cast %26 : vector<16x4xf32> to vector<1x16x4xf32>
    tpu.vector_store %arg3[%c0_19, %c0_20, %c0_21], %29 {strides = array<i32>} : memref<1x16x4xf32, #tpu.memory_space<vmem>>, vector<1x16x4xf32>,
    return
  }
  func.func @transform_0(%arg0: i32) -> (i32, i32, i32) {
    %c0_i32 = arith.constant 0 : i32
    %c0_i32_0 = arith.constant 0 : i32
    %c0_i32_1 = arith.constant 0 : i32
    return %arg0, %c0_i32, %c0_i32_0 : i32, i32, i32
  }
  func.func @transform_1(%arg0: i32) -> (i32, i32) {
    %c0_i32 = arith.constant 0 : i32
    %c0_i32_0 = arith.constant 0 : i32
    %c0_i32_1 = arith.constant 0 : i32
    return %c0_i32, %c0_i32_0 : i32, i32
  }
  func.func @transform_2(%arg0: i32) -> (i32, i32, i32) {
    %c0_i32 = arith.constant 0 : i32
    %c0_i32_0 = arith.constant 0 : i32
    %c0_i32_1 = arith.constant 0 : i32
    return %arg0, %c0_i32, %c0_i32_0 : i32, i32, i32
  }
}

</mosaic_0001>

<bundles_post_ra>
// kernel: tpu_custom_call.1
= control target key start
LH: loop header
LB: loop body
LE: loop exit
PB: predicated region body
PF: predicated region fallthrough
CT: control target
= control target key end

     0   :  { %7 = vsyncpa [#allocation4], 0  ;;  %s596_s0 = inlined_call_operand.hbm [shape: f32[8,16,16], index: 0, kind: input, shape index: {}]   ;;  %s597_s1 = inlined_call_operand.vmem [shape: f32[16,4], index: 1, kind: input, shape index: {}]   ;;  %s598_s2 = inlined_call_operand.vmem [shape: f32[2,16,4], index: 2, kind: output, shape index: {}]  }
   0x1   :  { %9 = vsyncpa [#allocation4 + $0x1], 0  ;;  %s489_s9 = smov 0   ;;  %s491_s10 = smov 0  }
   0x2   :  { %s493_s11 = smov 0   ;;  %s495_s12 = smov 0  }
   0x3 LB: > { %s508_s13 = sadd.s32 4294967295, %s469_s12   ;;  %s511_s14 = sadd.s32 1, %s469_s12   ;;  %s469_s12 = sphi %s495_s12, %s607_s12   ;;  %s465_s11 = sphi %s493_s11, %s606_s11   ;;  %s461_s10 = sphi %s491_s10, %s605_s10   ;;  %s457_s9 = sphi %s489_s9, %s604_s9  }
   0x4   : > { %s19_s15 = ssub.s32 %s469_s12, %s511_s14  ;;  %s22_s16 = sadd.s32 1, %s465_s11 }
   0x5   : > { %p20_p0 = scmp.eq.s32.totalorder %s19_s15, 0  ;;  %p29_p1 = scmp.ne.s32.totalorder %s465_s11, %s461_s10 }
   0x6   : > { %p30_p2 = scmp.eq.s32.totalorder %s469_s12, 0  ;;  %p35_p3 = scmp.ne.s32.totalorder %s461_s10, %s457_s9 }
   0x7   : > { %s521_s17 = scalar_select %p20_p0, %s465_s11, %s22_s16  }
   0x8   : > { %p31_p4 = por %p30_p2, %p29_p1  ;;  %p36_p5 = scmp.eq.s32.totalorder %s508_s13, 0 }
   0x9   : > { %p372_p6 = scmp.lt.s32.totalorder %s469_s12, 2  ;;  %s109_s19 = sand.u32 1, %s465_s11  }
   0xa   : > { %p525_p7 = por %p36_p5, %p35_p3  ;;  %s337_s20 = sshll.u32 %s109_s19, 6 }
   0xb   : > { %s353_s21 = sshll.u32 %s469_s12, 10  ;;  %s113_s25 = scalar_lea.vmem [#allocation3], %s337_s20 }
   0xc   : > { %s600_s18 = scalar_select %p525_p7, 1, 0 }
   0xd   : > { %s534_s24 = scalar_lea.hbm %s596_s0, %s353_s21  ;;  %s121_s26 = sshll.u32 %s113_s25, 4  ;;  %s536_s26 = int_to_ptr.vmem [resolvable:$true] %s121_s26 }
   0xe   : > { %p538_p8 = pnand %p372_p6, %p31_p4  ;;  %s543_s28 = scalar_lea.sflag [#allocation4], %s109_s19 }
   0xf   : > { %s407_s29 = scalar_lea.hbm %s534_s24, 1024  ;;  %s412_s4 = scalar_lea.hbm %s596_s0, 2048 }
  0x10   : > { %p408_p10 = scmp.ne.s32.totalorder %s534_s24, %s407_s29  ;;  %p409_p11 = pneg %p538_p8 }
  0x11   : > { %p413_p0 = scmp.lt.s32.totalorder %s534_s24, %s596_s0  ;;  %p414_p1 = scmp.lt.s32.totalorder %s412_s4, %s407_s29 }
  0x12   : > { %p410_p12 = pnand %p409_p11, %p408_p10 }
  0x13   : > { %p415_p2 = por %p414_p1, %p413_p0 }
  0x14   : > { %p411_p13 = pneg %p410_p12 }
  0x16   : > { %p416_p3 = pnand %p415_p2, %p411_p13 }
  0x18   : > { %419 = shalt.err (!%p416_p3)
}
  0x19   : > { %s420_s7 = scalar_lea.vmem %s536_s26, 1024  ;;  %s471_s8 = smov [#allocation3]  }
  0x1a   : > { %p421_p4 = scmp.ne.s32.totalorder %s536_s26, %s420_s7  ;;  %s425_s9 = sshll.u32 %s471_s8, 4  ;;  %s426_s9 = int_to_ptr.vmem [resolvable:$false] %s425_s9 }
  0x1b   : > { %s427_s15 = scalar_lea.vmem %s426_s9, 2048  ;;  %p428_p10 = scmp.lt.s32.totalorder %s536_s26, %s426_s9 }
  0x1c   : > { %p423_p5 = pnand %p421_p4, %p409_p11  ;;  %p429_p12 = scmp.lt.s32.totalorder %s427_s15, %s420_s7 }
  0x1e   : > { %p424_p6 = pneg %p423_p5  ;;  %p430_p9 = por %p429_p12, %p428_p10 }
  0x20   : > { %p431_p7 = pnand %p430_p9, %p424_p6 }
  0x22   : > { %434 = shalt.err (!%p431_p7)
}
  0x23   : > { %s472_s16 = smov 128   ;;  %s473_s19 = smov 8  }
  0x24   : > { %371 = dma.hbm_to_vmem [thread:$0]  (!%p538_p8), %s534_s24, 1024, %s536_s26, %s543_s28, %s472_s16, %s472_s16, %s473_s19  }
  0x25   : > { %p129_p11 = scmp.lt.s32.totalorder %s469_s12, 3  ;;  %p602_p13 = scmp.ge.s32.totalorder %s469_s12, 1 }
  0x27   : > { %p130_p0 = pnand %p602_p13, %p129_p11 }
  0x28   : > { %s135_s20 = sand.u32 (!%p130_p0), 1, %s461_s10   ;;  %p603_p7 = scmp.ne.s32.totalorder (!%p130_p0), %s600_s18, 0 }
  0x29   : > { %133 = sbr.rel (%p130_p0) target bundleno = 256 (0x100), region = 28  ;;  %s342_s21 = sshll.u32 (!%p130_p0), %s135_s20, 6 }
  0x2a   : > { %s136_s22 = scalar_lea.sflag (!%p130_p0), [#allocation4], %s135_s20  ;;  %s139_s23 = scalar_lea.vmem (!%p130_p0), [#allocation3], %s342_s21 }
  0x2e   : > { %452 = dma.done.wait (%p603_p7), %s136_s22, 1024  }
  0x2f   : > { %454 = vsyncadd (%p603_p7), %s136_s22, 4294966272  ;;  %vm167_vm0 = vcmask 125952   ;;  %v181_v0 = vld [vmem:[%s597_s1 + $0x8] sm:$0xff]  ;;  %v180_v1 = vld [vmem:[%s597_s1] sm:$0xff]  ;;  %vm182_vm1 = vcmask 130048   ;;  %p161_p8 = scmp.lt.s32.totalorder %s508_s13, 1 }
  0x30   : > { %v166_v2 = vld [vmem:[%s139_s23] ss:$4 sm:$0xf]  ;;  %359 = vmatprep.subr.mxu0 %v181_v0  ;;  %v345_v3 = vld [vmem:[%s139_s23 + $0x10] ss:$4 sm:$0xf] }
  0x31   : > { %168 = vst.msk [vmem:[#allocation2] sm:$0xf] %vm167_vm0, %v166_v2  ;;  %v346_v4 = vld [vmem:[%s139_s23 + $0x20] ss:$4 sm:$0xf]  ;;  %360 = vmatpush3.msra.mxu0 %v181_v0  ;;  %s609_s13 = smov (!%p161_p8, %s508_s13), 1 }
  0x32   : > { %171 = vst.msk [vmem:[#allocation2 + $0x4] sm:$0xf] %vm167_vm0, %v345_v3  ;;  %174 = vst.msk [vmem:[#allocation2 + $0x8] sm:$0xf] %vm167_vm0, %v346_v4  ;;  %361 = vmatprep.subr.mxu0 %v180_v1  ;;  %s354_s18 = sshll.u32 %s609_s13, 4  ;;  %vm264_vm2 = vcmask 31744  }
  0x33   : > { %v347_v5 = vld [vmem:[%s139_s23 + $0x30] ss:$4 sm:$0xf]  ;;  %362 = vmatpush3.msra.mxu0 %v180_v1  ;;  %s165_s28 = scalar_lea.vmem %s598_s2, %s354_s18 }
  0x34   : > { %177 = vst.msk [vmem:[#allocation2 + $0xc] sm:$0xf] %vm167_vm0, %v347_v5 }
  0x39   : > { %v178_v6 = vld [vmem:[#allocation2] sm:$0xff] }
  0x3a   : > { %363 = vmatprep.mubr.msk.f32.mxu0 %vm182_vm1, %v178_v6 }
  0x3b   : > { %v179_v7 = vld [vmem:[#allocation2 + $0x8] sm:$0xff] }
  0x3c   : > { %364 = vmatmul.mubr.msk.f32.vlgmr.msra.gmra.mxu0 %vm182_vm1, %v179_v7 }
  0xfc   : > { %v365_v8 = vpop.f32.mrf.mxu0 }
  0xfd   : > { %266 = vst.msk [vmem:[%s165_s28 + $0x8] sm:$0xff] %vm264_vm2, %v365_v8 }
  0xfe   : > { %v255_v9 = vpop.f32.mrf.mxu0 }
  0xff   : > { %265 = vst.msk [vmem:[%s165_s28] sm:$0xff] %vm264_vm2, %v255_v9 }
 0x100 PF: > { %p12_p9 = scmp.ge.s32.totalorder %s511_s14, 4   ;;  %s604_s9 = smov %s461_s10 }
 0x101   : > { %s605_s10 = smov %s465_s11  ;;  %s606_s11 = smov %s521_s17 }
 0x102   : > { %s607_s12 = smov %s511_s14  ;;  %14 = sbr.rel (!%p12_p9) target bundleno = 3 (0x3), region = 71 }
 0x107   :  { %288 = vsyncpa [#allocation4], 1 }
 0x108   :  { %290 = vsyncpa [#allocation4 + $0x1], 1 }

</bundles_post_ra>
